<compile_context>
chip_gen: v7x
topology: tpu7x:2x2x1
jax: 0.10.0
libtpu: 0.0.40
codegen_flags: <defaults>
</compile_context>

<pallas_src>
import functools

import jax
import jax.numpy as jnp
import numpy as np
from jax.experimental import pallas as pl
from jax.experimental.pallas import tpu as pltpu

NEG_SLOPE = 0.01  # torch.nn.functional.leaky_relu default negative_slope


def _round_up(x, m):
    return (x + m - 1) // m * m


# ------------------------------- fused CNN kernel ------------------------------------
def _cnn_fused_kernel(x_ref, wc_ref, bc_ref, wfc_ref, bfc_ref, o_ref, act_ref, *,
                      depth, K, dilation, pad, C_in, C_pad, L, L_BUF, n_class):
    # x_ref   : (1, C_in, L)            raw input for this batch element
    # wc_ref  : (depth, C_pad, K*C_pad) folded conv weights (tap-major columns)
    # bc_ref  : (depth, C_pad, 1)       conv biases (zero-padded rows)
    # wfc_ref : (NCLS_P, C_pad)         FC weight (zero-padded)
    # bfc_ref : (NCLS_P, 1)             FC bias   (zero-padded)
    # o_ref   : (1, NCLS_P, 1)          logits (padded rows sliced off by wrapper)
    # act_ref : (C_pad, L_BUF)          VMEM scratch: lane-dense activation buffer

    # In-kernel zero padding: data lives at lanes [pad, pad+L), rows [0, C_in).
    act_ref[...] = jnp.zeros((C_pad, L_BUF), jnp.float32)
    act_ref[0:C_in, pad:pad + L] = x_ref[0].astype(jnp.float32)
    act = act_ref[...]

    col = jax.lax.broadcasted_iota(jnp.int32, (C_pad, L_BUF), 1)

    L_cur = L
    for d in range(depth):                      # static unroll over layers (tiny depth)
        w = wc_ref[d]                           # (C_pad, K*C_pad)
        b = bc_ref[d]                           # (C_pad, 1)
        # Fold the K taps into one contraction: tap k is the activation rolled right by
        # (pad - k*dilation) lanes (wrap lands in zero regions / masked-off columns).
        taps = []
        for k in range(K):
            r = pad - k * dilation
            taps.append(act if r == 0 else pltpu.roll(act, r, 1))
        stacked = jnp.concatenate(taps, axis=0)  # (K*C_pad, L_BUF)

        y = jnp.dot(w, stacked, preferred_element_type=jnp.float32) + b
        y = jnp.where(y >= 0, y, NEG_SLOPE * y)  # fused leaky_relu

        L_cur = L_cur + pad                      # conv output length: L + (K-1)*dilation
        valid = (col >= pad) & (col < pad + L_cur)
        act = jnp.where(valid, y, 0.0)           # keep buffer zero outside valid window

    # AdaptiveMaxPool1d(1): max over the valid length only (activations can be negative).
    pool_mask = (col >= pad) & (col < pad + L_cur)
    pooled = jnp.max(jnp.where(pool_mask, act, -jnp.inf), axis=1, keepdims=True)  # (C_pad,1)

    logits = jnp.dot(wfc_ref[...], pooled, preferred_element_type=jnp.float32) + bfc_ref[...]
    o_ref[0] = logits.astype(o_ref.dtype)        # (NCLS_P, 1)


# ------------------------------ one-time weight packing ------------------------------
def pack_params(params, *, dilation=1):
    """Fold/pad all weights once (hoisted out of the forward path)."""
    conv = params["conv"]
    K = conv[0][0].shape[-1]
    chans = [w.shape[0] for w, _ in conv] + [w.shape[1] for w, _ in conv]
    C_pad = _round_up(max(chans), 8)             # sublane-align channels

    wcs, bcs = [], []
    for w, b in conv:
        C_out, C_in, K_ = w.shape
        assert K_ == K
        wf = jnp.zeros((C_pad, K, C_pad), jnp.float32)
        wf = wf.at[:C_out, :, :C_in].set(jnp.transpose(w, (0, 2, 1)))  # [co, k, ci]
        wcs.append(wf.reshape(C_pad, K * C_pad))
        bcs.append(jnp.zeros((C_pad, 1), jnp.float32).at[:C_out, 0].set(b))
    wc = jnp.stack(wcs)                           # (depth, C_pad, K*C_pad)
    bc = jnp.stack(bcs)                           # (depth, C_pad, 1)

    fc_w, fc_b = params["fc_w"], params["fc_b"]
    n_class, mid = fc_w.shape
    NCLS_P = _round_up(n_class, 8)
    wfc = jnp.zeros((NCLS_P, C_pad), jnp.float32).at[:n_class, :mid].set(fc_w)
    bfc = jnp.zeros((NCLS_P, 1), jnp.float32).at[:n_class, 0].set(fc_b)

    return {"wc": wc, "bc": bc, "wfc": wfc, "bfc": bfc,
            "K": K, "C_pad": C_pad, "n_class": n_class, "dilation": dilation}


# ----------------------------------- CNN forward -------------------------------------
def cnn_forward(x, packed):
    N, C_in, L = x.shape
    wc, bc, wfc, bfc = packed["wc"], packed["bc"], packed["wfc"], packed["bfc"]
    depth, C_pad, KC = wc.shape
    K, dilation = packed["K"], packed["dilation"]
    n_class = packed["n_class"]
    NCLS_P = wfc.shape[0]
    pad = (K - 1) * dilation

    # Lane-dense activation width; must hold the deepest padded activation.
    L_need = L + (depth + 1) * pad
    L_BUF = _round_up(L_need, 128)
    assert C_in <= C_pad

    kernel = functools.partial(
        _cnn_fused_kernel, depth=depth, K=K, dilation=dilation, pad=pad,
        C_in=C_in, C_pad=C_pad, L=L, L_BUF=L_BUF, n_class=n_class)

    out = pl.pallas_call(
        kernel,
        out_shape=jax.ShapeDtypeStruct((N, NCLS_P, 1), jnp.float32),
        grid_spec=pltpu.PrefetchScalarGridSpec(
            num_scalar_prefetch=0,
            grid=(N,),  # one batch element per step; "parallel" -> both v7x TCs busy
            in_specs=[
                pl.BlockSpec((1, C_in, L), lambda n: (n, 0, 0)),
                pl.BlockSpec((depth, C_pad, KC), lambda n: (0, 0, 0)),
                pl.BlockSpec((depth, C_pad, 1), lambda n: (0, 0, 0)),
                pl.BlockSpec((NCLS_P, C_pad), lambda n: (0, 0)),
                pl.BlockSpec((NCLS_P, 1), lambda n: (0, 0)),
            ],
            out_specs=pl.BlockSpec((1, NCLS_P, 1), lambda n: (n, 0, 0)),
            scratch_shapes=[pltpu.VMEM((C_pad, L_BUF), jnp.float32)],
        ),
        compiler_params=pltpu.CompilerParams(dimension_semantics=("parallel",)),
    )(x, wc, bc, wfc, bfc)

    return out[:, :n_class, 0]                   # drop padded class rows -> (N, n_class)


# ------------------------------- pure-JAX reference ----------------------------------
def cnn_reference(x, params, *, dilation=1):
    for w, b in params["conv"]:
        K = w.shape[-1]
        pad = (K - 1) * dilation
        y = jax.lax.conv_general_dilated(
            x, w, window_strides=(1,), padding=[(pad, pad)],
            rhs_dilation=(dilation,), dimension_numbers=("NCH", "OIH", "NCH"),
        ) + b[None, :, None]
        x = jnp.where(y >= 0, y, NEG_SLOPE * y)
    pooled = jnp.max(x, axis=-1)
    return pooled @ params["fc_w"].T + params["fc_b"]


# --------------------------------------- main ----------------------------------------
def init_params(key, in_features, mid_features, n_class, depth, kernel_size=3):
    ks = jax.random.split(key, 2 * depth + 2)
    conv = []
    c_in = in_features
    for d in range(depth):
        w = 0.1 * jax.random.normal(ks[2 * d], (mid_features, c_in, kernel_size), jnp.float32)
        b = 0.1 * jax.random.normal(ks[2 * d + 1], (mid_features,), jnp.float32)
        conv.append((w, b))
        c_in = mid_features
    fc_w = 0.1 * jax.random.normal(ks[-2], (n_class, mid_features), jnp.float32)
    fc_b = 0.1 * jax.random.normal(ks[-1], (n_class,), jnp.float32)
    return {"conv": conv, "fc_w": fc_w, "fc_b": fc_b}


if __name__ == "__main__":
    N, in_features, L = 2, 4, 16
    mid_features, n_class, depth, dilation = 8, 5, 2, 1

    key = jax.random.PRNGKey(0)
    k_param, k_x = jax.random.split(key)
    params = init_params(k_param, in_features, mid_features, n_class, depth)
    x = jax.random.normal(k_x, (N, in_features, L), jnp.float32)

    packed = pack_params(params, dilation=dilation)   # weight fold/pad hoisted, done once
    out = jax.block_until_ready(cnn_forward(x, packed))

    ref = jax.block_until_ready(cnn_reference(x, params, dilation=dilation))
    assert out.shape == (N, n_class), out.shape
    if not np.allclose(np.asarray(out), np.asarray(ref), rtol=2e-4, atol=2e-4):
        raise AssertionError("Pallas fused CNN output mismatch vs reference")

    print("KERNEL_OK")
</pallas_src>

<mosaic_0001>
module attributes {stable_mosaic.version = 11 : i64} {
  func.func @_cnn_fused_kernel(%arg0: i32, %arg1: memref<1x4x16xf32, #tpu.memory_space<vmem>>, %arg2: memref<2x8x24xf32, #tpu.memory_space<vmem>>, %arg3: memref<2x8x1xf32, #tpu.memory_space<vmem>>, %arg4: memref<8x8xf32, #tpu.memory_space<vmem>>, %arg5: memref<8x1xf32, #tpu.memory_space<vmem>>, %arg6: memref<1x8x1xf32, #tpu.memory_space<vmem>>, %arg7: memref<8x128xf32, #tpu.memory_space<vmem>>) attributes {dimension_semantics = [#tpu.dimension_semantics<parallel>], iteration_bounds = array<i64: 2>, scalar_prefetch = 0 : i64, scratch_operands = 1 : i64, tpu.core_type = #tpu.core_type<tc>, window_params = [{transform_indices = @transform_0, window_bounds = array<i64: 1, 4, 16>}, {pipeline_mode = #tpu.pipeline_mode<synchronous>, transform_indices = @transform_1, window_bounds = array<i64: 2, 8, 24>}, {pipeline_mode = #tpu.pipeline_mode<synchronous>, transform_indices = @transform_2, window_bounds = array<i64: 2, 8, 1>}, {pipeline_mode = #tpu.pipeline_mode<synchronous>, transform_indices = @transform_3, window_bounds = array<i64: 8, 8>}, {pipeline_mode = #tpu.pipeline_mode<synchronous>, transform_indices = @transform_4, window_bounds = array<i64: 8, 1>}, {transform_indices = @transform_5, window_bounds = array<i64: 1, 8, 1>}]} {
    %cst = arith.constant 0.000000e+00 : f32
    %0 = vector.broadcast %cst : f32 to vector<8x128xf32>
    %c0 = arith.constant 0 : index
    %c0_0 = arith.constant 0 : index
    %1 = vector.load %arg7[%c0, %c0_0] : memref<8x128xf32, #tpu.memory_space<vmem>>, vector<8x128xf32>
    tpu.vector_store %arg7[%c0, %c0_0], %0 {strides = array<i32>} : memref<8x128xf32, #tpu.memory_space<vmem>>, vector<8x128xf32>,
    %c0_1 = arith.constant 0 : index
    %c0_2 = arith.constant 0 : index
    %c0_3 = arith.constant 0 : index
    %2 = vector.load %arg1[%c0_1, %c0_2, %c0_3] : memref<1x4x16xf32, #tpu.memory_space<vmem>>, vector<1x4x16xf32>
    %3 = vector.shape_cast %2 : vector<1x4x16xf32> to vector<4x16xf32>
    %c0_4 = arith.constant 0 : index
    %c2 = arith.constant 2 : index
    %4 = vector.load %arg7[%c0_4, %c2] : memref<8x128xf32, #tpu.memory_space<vmem>>, vector<4x16xf32>
    tpu.vector_store %arg7[%c0_4, %c2], %3 {strides = array<i32>} : memref<8x128xf32, #tpu.memory_space<vmem>>, vector<4x16xf32>,
    %c0_5 = arith.constant 0 : index
    %c0_6 = arith.constant 0 : index
    %5 = vector.load %arg7[%c0_5, %c0_6] : memref<8x128xf32, #tpu.memory_space<vmem>>, vector<8x128xf32>
    %6 = tpu.iota {dimensions = array<i32: 1>} : vector<8x128xi32>
    %c0_7 = arith.constant 0 : index
    %c0_8 = arith.constant 0 : index
    %c0_9 = arith.constant 0 : index
    %7 = vector.load %arg2[%c0_7, %c0_8, %c0_9] : memref<2x8x24xf32, #tpu.memory_space<vmem>>, vector<1x8x24xf32>
    %8 = vector.shape_cast %7 : vector<1x8x24xf32> to vector<8x24xf32>
    %c0_10 = arith.constant 0 : index
    %c0_11 = arith.constant 0 : index
    %c0_12 = arith.constant 0 : index
    %9 = vector.load %arg3[%c0_10, %c0_11, %c0_12] : memref<2x8x1xf32, #tpu.memory_space<vmem>>, vector<1x8x1xf32>
    %10 = vector.shape_cast %9 : vector<1x8x1xf32> to vector<8x1xf32>
    %c2_i32 = arith.constant 2 : i32
    %11 = tpu.dynamic_rotate %5 by %c2_i32 dim 1 : vector<8x128xf32>, i32 -> vector<8x128xf32>
    %c1_i32 = arith.constant 1 : i32
    %12 = tpu.dynamic_rotate %5 by %c1_i32 dim 1 : vector<8x128xf32>, i32 -> vector<8x128xf32>
    %13 = tpu.concatenate %11, %12, %5 in 0 : vector<8x128xf32>, vector<8x128xf32>, vector<8x128xf32> -> vector<24x128xf32>
    %cst_13 = arith.constant dense<0.000000e+00> : vector<8x128xf32>
    %14 = tpu.matmul %8, %13, %cst_13 {dimension_numbers = #tpu.dot_dimension_numbers<[1], [0], [0], [1], [0, 0, 1, 1], [], []>} : vector<8x24xf32>, vector<24x128xf32>, vector<8x128xf32> -> vector<8x128xf32>
    %15 = vector.broadcast %10 : vector<8x1xf32> to vector<8x128xf32>
    %16 = arith.addf %14, %15 : vector<8x128xf32>
    %cst_14 = arith.constant 0.000000e+00 : f32
    %17 = vector.broadcast %cst_14 : f32 to vector<8x128xf32>
    %18 = arith.cmpf oge, %16, %17 : vector<8x128xf32>
    %cst_15 = arith.constant 0.00999999977 : f32
    %19 = vector.broadcast %cst_15 : f32 to vector<8x128xf32>
    %20 = arith.mulf %19, %16 : vector<8x128xf32>
    %21 = arith.select %18, %16, %20 : vector<8x128xi1>, vector<8x128xf32>
    %c2_i32_16 = arith.constant 2 : i32
    %22 = vector.broadcast %c2_i32_16 : i32 to vector<8x128xi32>
    %23 = arith.cmpi sge, %6, %22 : vector<8x128xi32>
    %c20_i32 = arith.constant 20 : i32
    %24 = vector.broadcast %c20_i32 : i32 to vector<8x128xi32>
    %25 = arith.cmpi slt, %6, %24 : vector<8x128xi32>
    %26 = arith.andi %23, %25 : vector<8x128xi1>
    %cst_17 = arith.constant 0.000000e+00 : f32
    %27 = vector.broadcast %cst_17 : f32 to vector<8x128xf32>
    %28 = arith.select %26, %21, %27 : vector<8x128xi1>, vector<8x128xf32>
    %c1 = arith.constant 1 : index
    %c0_18 = arith.constant 0 : index
    %c0_19 = arith.constant 0 : index
    %29 = vector.load %arg2[%c1, %c0_18, %c0_19] : memref<2x8x24xf32, #tpu.memory_space<vmem>>, vector<1x8x24xf32>
    %30 = vector.shape_cast %29 : vector<1x8x24xf32> to vector<8x24xf32>
    %c1_20 = arith.constant 1 : index
    %c0_21 = arith.constant 0 : index
    %c0_22 = arith.constant 0 : index
    %31 = vector.load %arg3[%c1_20, %c0_21, %c0_22] : memref<2x8x1xf32, #tpu.memory_space<vmem>>, vector<1x8x1xf32>
    %32 = vector.shape_cast %31 : vector<1x8x1xf32> to vector<8x1xf32>
    %c2_i32_23 = arith.constant 2 : i32
    %33 = tpu.dynamic_rotate %28 by %c2_i32_23 dim 1 : vector<8x128xf32>, i32 -> vector<8x128xf32>
    %c1_i32_24 = arith.constant 1 : i32
    %34 = tpu.dynamic_rotate %28 by %c1_i32_24 dim 1 : vector<8x128xf32>, i32 -> vector<8x128xf32>
    %35 = tpu.concatenate %33, %34, %28 in 0 : vector<8x128xf32>, vector<8x128xf32>, vector<8x128xf32> -> vector<24x128xf32>
    %cst_25 = arith.constant dense<0.000000e+00> : vector<8x128xf32>
    %36 = tpu.matmul %30, %35, %cst_25 {dimension_numbers = #tpu.dot_dimension_numbers<[1], [0], [0], [1], [0, 0, 1, 1], [], []>} : vector<8x24xf32>, vector<24x128xf32>, vector<8x128xf32> -> vector<8x128xf32>
    %37 = vector.broadcast %32 : vector<8x1xf32> to vector<8x128xf32>
    %38 = arith.addf %36, %37 : vector<8x128xf32>
    %cst_26 = arith.constant 0.000000e+00 : f32
    %39 = vector.broadcast %cst_26 : f32 to vector<8x128xf32>
    %40 = arith.cmpf oge, %38, %39 : vector<8x128xf32>
    %cst_27 = arith.constant 0.00999999977 : f32
    %41 = vector.broadcast %cst_27 : f32 to vector<8x128xf32>
    %42 = arith.mulf %41, %38 : vector<8x128xf32>
    %43 = arith.select %40, %38, %42 : vector<8x128xi1>, vector<8x128xf32>
    %c2_i32_28 = arith.constant 2 : i32
    %44 = vector.broadcast %c2_i32_28 : i32 to vector<8x128xi32>
    %45 = arith.cmpi sge, %6, %44 : vector<8x128xi32>
    %c22_i32 = arith.constant 22 : i32
    %46 = vector.broadcast %c22_i32 : i32 to vector<8x128xi32>
    %47 = arith.cmpi slt, %6, %46 : vector<8x128xi32>
    %48 = arith.andi %45, %47 : vector<8x128xi1>
    %cst_29 = arith.constant 0.000000e+00 : f32
    %49 = vector.broadcast %cst_29 : f32 to vector<8x128xf32>
    %50 = arith.select %48, %43, %49 : vector<8x128xi1>, vector<8x128xf32>
    %c2_i32_30 = arith.constant 2 : i32
    %51 = vector.broadcast %c2_i32_30 : i32 to vector<8x128xi32>
    %52 = arith.cmpi sge, %6, %51 : vector<8x128xi32>
    %c22_i32_31 = arith.constant 22 : i32
    %53 = vector.broadcast %c22_i32_31 : i32 to vector<8x128xi32>
    %54 = arith.cmpi slt, %6, %53 : vector<8x128xi32>
    %55 = arith.andi %52, %54 : vector<8x128xi1>
    %cst_32 = arith.constant 0xFF800000 : f32
    %56 = vector.broadcast %cst_32 : f32 to vector<8x128xf32>
    %57 = arith.select %55, %50, %56 : vector<8x128xi1>, vector<8x128xf32>
    %cst_33 = arith.constant dense<0xFF800000> : vector<8xf32>
    %58 = vector.multi_reduction <maximumf>, %57, %cst_33 [1] : vector<8x128xf32> to vector<8xf32>
    %59 = vector.shape_cast %58 : vector<8xf32> to vector<8x1xf32>
    %c0_34 = arith.constant 0 : index
    %c0_35 = arith.constant 0 : index
    %60 = vector.load %arg4[%c0_34, %c0_35] : memref<8x8xf32, #tpu.memory_space<vmem>>, vector<8x8xf32>
    %cst_36 = arith.constant dense<0.000000e+00> : vector<8x1xf32>
    %61 = tpu.matmul %60, %59, %cst_36 {dimension_numbers = #tpu.dot_dimension_numbers<[1], [0], [0], [1], [0, 0, 1, 1], [], []>} : vector<8x8xf32>, vector<8x1xf32>, vector<8x1xf32> -> vector<8x1xf32>
    %c0_37 = arith.constant 0 : index
    %c0_38 = arith.constant 0 : index
    %62 = vector.load %arg5[%c0_37, %c0_38] : memref<8x1xf32, #tpu.memory_space<vmem>>, vector<8x1xf32>
    %63 = arith.addf %61, %62 : vector<8x1xf32>
    %c0_39 = arith.constant 0 : index
    %c0_40 = arith.constant 0 : index
    %c0_41 = arith.constant 0 : index
    %64 = vector.load %arg6[%c0_39, %c0_40, %c0_41] : memref<1x8x1xf32, #tpu.memory_space<vmem>>, vector<1x8x1xf32>
    %65 = vector.shape_cast %64 : vector<1x8x1xf32> to vector<8x1xf32>
    %66 = vector.shape_cast %63 : vector<8x1xf32> to vector<1x8x1xf32>
    tpu.vector_store %arg6[%c0_39, %c0_40, %c0_41], %66 {strides = array<i32>} : memref<1x8x1xf32, #tpu.memory_space<vmem>>, vector<1x8x1xf32>,
    return
  }
  func.func @transform_0(%arg0: i32) -> (i32, i32, i32) {
    %c0_i32 = arith.constant 0 : i32
    %c0_i32_0 = arith.constant 0 : i32
    %c0_i32_1 = arith.constant 0 : i32
    return %arg0, %c0_i32, %c0_i32_0 : i32, i32, i32
  }
  func.func @transform_1(%arg0: i32) -> (i32, i32, i32) {
    %c0_i32 = arith.constant 0 : i32
    %c0_i32_0 = arith.constant 0 : i32
    %c0_i32_1 = arith.constant 0 : i32
    %c0_i32_2 = arith.constant 0 : i32
    return %c0_i32, %c0_i32_0, %c0_i32_1 : i32, i32, i32
  }
  func.func @transform_2(%arg0: i32) -> (i32, i32, i32) {
    %c0_i32 = arith.constant 0 : i32
    %c0_i32_0 = arith.constant 0 : i32
    %c0_i32_1 = arith.constant 0 : i32
    %c0_i32_2 = arith.constant 0 : i32
    return %c0_i32, %c0_i32_0, %c0_i32_1 : i32, i32, i32
  }
  func.func @transform_3(%arg0: i32) -> (i32, i32) {
    %c0_i32 = arith.constant 0 : i32
    %c0_i32_0 = arith.constant 0 : i32
    %c0_i32_1 = arith.constant 0 : i32
    return %c0_i32, %c0_i32_0 : i32, i32
  }
  func.func @transform_4(%arg0: i32) -> (i32, i32) {
    %c0_i32 = arith.constant 0 : i32
    %c0_i32_0 = arith.constant 0 : i32
    %c0_i32_1 = arith.constant 0 : i32
    return %c0_i32, %c0_i32_0 : i32, i32
  }
  func.func @transform_5(%arg0: i32) -> (i32, i32, i32) {
    %c0_i32 = arith.constant 0 : i32
    %c0_i32_0 = arith.constant 0 : i32
    %c0_i32_1 = arith.constant 0 : i32
    return %arg0, %c0_i32, %c0_i32_0 : i32, i32, i32
  }
}

</mosaic_0001>

<bundles_post_ra>
// kernel: tpu_custom_call.1
= control target key start
LH: loop header
LB: loop body
LE: loop exit
PB: predicated region body
PF: predicated region fallthrough
CT: control target
= control target key end

     0   :  { %s662_s18 = smov 0   ;;  %s711_s0 = inlined_call_operand.vmem [shape: f32[2,4,16], index: 0, kind: input, shape index: {}]   ;;  %s712_s1 = inlined_call_operand.vmem [shape: f32[2,8,24], index: 1, kind: input, shape index: {}]   ;;  %s713_s2 = inlined_call_operand.vmem [shape: f32[2,8,1], index: 2, kind: input, shape index: {}]   ;;  %s714_s3 = inlined_call_operand.vmem [shape: f32[8,8], index: 3, kind: input, shape index: {}]   ;;  %s715_s4 = inlined_call_operand.vmem [shape: f32[8,1], index: 4, kind: input, shape index: {}]   ;;  %s716_s5 = inlined_call_operand.vmem [shape: f32[2,8,1], index: 5, kind: output, shape index: {}]  }
   0x1 LB: > { %s548_s19 = sadd.s32 4294967295, %s624_s18   ;;  %p552_p0 = scmp.ge.s32.totalorder %s624_s18, 1  ;;  %s624_s18 = sphi %s662_s18, %s15_s18  }
   0x2   : > { %p186_p1 = scmp.lt.s32.totalorder %s624_s18, 3 }
   0x4   : > { %p187_p2 = pnand %p552_p0, %p186_p1 }
   0x5   : > { %p212_p3 = scmp.lt.s32.totalorder (!%p187_p2), %s548_s19, 1  ;;  %v626_v0 = vmov (!%p187_p2), 0.0   ;;  %s627_s24 = smov (!%p187_p2), 2   ;;  %v628_v2 = vmov (!%p187_p2), 0.0|0.0   ;;  %vm226_vm0 = vcmask (!%p187_p2), 142352   ;;  %vm629_vm1 = vmmov (!%p187_p2), 0  }
   0x6   : > { %190 = sbr.rel (%p187_p2) target bundleno = 1178 (0x49a), region = 40  ;;  %220 = vst [vmem:[#allocation2] sm:$0xff] (!%p187_p2), %v626_v0  ;;  %596 = vmatprep.subr.bf16.mxu0 (!%p187_p2), %v628_v2  ;;  %599 = vmatprep.subr.bf16.mxu1 (!%p187_p2), %v628_v2  ;;  %v630_v4 = vmov (!%p187_p2), 0   ;;  %s631_s25 = smov (!%p187_p2), 1   ;;  %v232_v6 = vld [vmem:[%s713_s2] sm:$0xff] (!%p187_p2)  ;;  %vm242_vm2 = vcmask (!%p187_p2), 195584   ;;  %v229_v11 = vlaneseq (!%p187_p2) }
   0x7   : > { %579 = vmatprep.mubr.msk.f32.mxu0 (!%p187_p2), %vm629_vm1, %v626_v0  ;;  %588 = vmatprep.mubr.msk.f32.mxu1 (!%p187_p2), %vm629_vm1, %v626_v0  ;;  %v231_v10 = vld [vmem:[%s712_s1] sm:$0xff] (!%p187_p2)  ;;  %v557_v20 = vld [vmem:[%s713_s2 + $0x8] sm:$0xff] (!%p187_p2)  ;;  %vm419_vm10 = vcmask (!%p187_p2), 64512   ;;  %vm493_vm11 = vcmask (!%p187_p2), 7168  }
   0x8   : > { %616 = vset.pattern.permute.xlu1 (!%p187_p2), %v630_v4  ;;  %617 = vset.pattern.permute.xlu0 (!%p187_p2), %v630_v4  ;;  %v230_v12 = vand.u32 (!%p187_p2), 127, %v229_v11  ;;  %v556_v24 = vld [vmem:[%s712_s1 + $0x8] sm:$0xff] (!%p187_p2)  ;;  %v417_v32 = vld [vmem:[%s714_s3] sm:$0xff] (!%p187_p2) }
   0x9   : > { %v418_v34 = vld [vmem:[%s715_s4] sm:$0xff] (!%p187_p2) }
   0xa   : > { %vm319_vm3 = vcmp.ge.s32.totalorder (!%p187_p2), %v230_v12, 2  ;;  %vm320_vm4 = vcmp.lt.s32.totalorder (!%p187_p2), %v230_v12, 20  ;;  %vm412_vm7 = vcmp.lt.s32.totalorder (!%p187_p2), %v230_v12, 22 }
   0xb   : > { %vm321_vm6 = vmand (!%p187_p2), %vm319_vm3, %vm320_vm4 }
   0xc   : > { %vm413_vm9 = vmand (!%p187_p2), %vm319_vm3, %vm412_vm7 }
   0xd   : > { %s718_s19 = smov (!%p212_p3, %s548_s19), 1 }
   0xe   : > { %s553_s20 = sshll.u32 %s718_s19, 2  ;;  %s554_s11 = sshll.u32 %s718_s19, 3 }
   0xf   : > { %s215_s23 = scalar_lea.vmem %s711_s0, %s553_s20  ;;  %s219_s16 = scalar_lea.vmem %s716_s5, %s554_s11 }
  0x10   : > { %v221_v1 = vld [vmem:[%s215_s23] sm:$0xf] }
  0x11   : > { %223 = vrot.lane.b32.xlu0 %v221_v1, %s627_s24 }
  0x83   : > { %v224_v3 = vpop.permute.xlu0 %223 }
  0x84   : > { %227 = vst.msk [vmem:[#allocation2] sm:$0xf] %vm226_vm0, %v224_v3 }
  0x8b   : > { %v228_v5 = vld [vmem:[#allocation2] sm:$0xff] }
  0x8c   : > { %235 = vrot.lane.b32.xlu1 %v228_v5, %s631_s25  ;;  %233 = vrot.lane.b32.xlu0 %v228_v5, %s627_s24 }
  0x90   : > { %239 = vperm.xlu1 %616, %v232_v6  }
  0xfe   : > { %v236_v7 = vpop.permute.xlu1 %235  ;;  %v234_v8 = vpop.permute.xlu0 %233 }
  0xff   : > { %v597_v9 = vpack.c.bf16 %v236_v7, %v234_v8 }
 0x101   : > { %598 = vmatpush3.bf16.msra.mxu0 %v597_v9 }
 0x102   : > { %577 = vmatprep.subr.mxu0 %v626_v0 }
 0x105   : > { %578 = vmatpush3.msra.mxu0 %v228_v5 }
 0x106   : > { %580 = vmatmul.mubr.msk.f32.vlgmr.msra.gmra.mrb[0].mxu0 %vm242_vm2, %v231_v10  ;;  %591 = vmatprep.subr.mxu0 %v626_v0 }
 0x107   : > { %593 = vmatprep.mubr.msk.f32.mxu0 %vm629_vm1, %v626_v0 }
 0x10f   : > { %v240_v13 = vpop.permute.xlu1 %239 }
 0x1d9   : > { %v312_v14 = vpop.f32.mrb[0].mxu0 }
 0x1da   : > { %v313_v15 = vadd.f32 %v312_v14, %v240_v13  ;;  %v581_v16 = vpop.f32.mrb[1].mxu0 }
 0x1dc   : > { %v317_v17 = vmul.f32 0.01, %v313_v15  ;;  %vm316_vm5 = vcmp.ge.f32.partialorder %v313_v15, 0.0 }
 0x1de   : > { %v318_v18 = vsel %vm316_vm5, %v313_v15, %v317_v17 }
 0x1df   : > { %v322_v19 = vsel %vm321_vm6, %v318_v18, 0.0 }
 0x1e0   : > { %329 = vrot.lane.b32.xlu1 %v322_v19, %s631_s25  ;;  %327 = vrot.lane.b32.xlu0 %v322_v19, %s627_s24 }
 0x1e4   : > { %333 = vperm.xlu0 %617, %v557_v20  }
 0x252   : > { %v330_v21 = vpop.permute.xlu1 %329  ;;  %v328_v22 = vpop.permute.xlu0 %327 }
 0x253   : > { %v600_v23 = vpack.c.bf16 %v330_v21, %v328_v22 }
 0x255   : > { %601 = vmatpush3.bf16.msra.mxu1 %v600_v23 }
 0x256   : > { %586 = vmatprep.subr.mxu1 %v626_v0 }
 0x259   : > { %587 = vmatpush3.msk.msra.mxu1 %vm321_vm6, %v318_v18 }
 0x25a   : > { %589 = vmatmul.mubr.msk.f32.vlgmr.msra.gmra.mrb[0].mxu1 %vm242_vm2, %v556_v24 }
 0x263   : > { %v334_v25 = vpop.permute.xlu0 %333 }
 0x32d   : > { %v405_v26 = vpop.f32.mrb[0].mxu1 }
 0x32e   : > { %v406_v27 = vadd.f32 %v405_v26, %v334_v25  ;;  %v590_v28 = vpop.f32.mrb[1].mxu1 }
 0x330   : > { %v410_v29 = vmul.f32 0.01, %v406_v27  ;;  %vm409_vm8 = vcmp.ge.f32.partialorder %v406_v27, 0.0 }
 0x332   : > { %v411_v30 = vsel %vm409_vm8, %v406_v27, %v410_v29 }
 0x333   : > { %v414_v31 = vsel %vm413_vm9, %v411_v30, -inf }
 0x334   : > { %415 = vmax.xlane.f32.xlu1 %v414_v31 }
 0x3c1   : > { %v416_v33 = vpop.xlane.xlu1 %415 }
 0x3c2   : > { %592 = vmatpush3.msra.mxu0 %v416_v33 }
 0x3c3   : > { %594 = vmatmul.mubr.msk.f32.vlgmr.msra.gmra.mrb[2].mxu0 %vm419_vm10, %v417_v32 }
 0x496   : > { %v489_v35 = vpop.f32.mrb[2].mxu0 }
 0x497   : > { %v490_v36 = vadd.f32 %v489_v35, %v418_v34  ;;  %v595_v37 = vpop.f32.mrb[3].mxu0 }
 0x499   : > { %494 = vst.msk [vmem:[%s219_s16] sm:$0xff] %vm493_vm11, %v490_v36 }
 0x49a PF: > { %s15_s18 = sadd.s32 1, %s624_s18  }
 0x49b   : > { %p12_p4 = scmp.ge.s32.totalorder %s15_s18, 4  }
 0x49d   :  { %14 = sbr.rel (!%p12_p4) target bundleno = 1 (0x1), region = 72 }

</bundles_post_ra>
